<compile_context>
chip_gen: v5e
topology: v5e:2x2
jax: 0.10.0
libtpu: 0.0.40
codegen_flags: <defaults>
</compile_context>

<pallas_src>
import functools
import math

import jax
import jax.numpy as jnp
from jax import lax
from jax.experimental import pallas as pl
from jax.experimental.pallas import tpu as pltpu


# ----------------------- per-generation VMEM budget -----------------------

def _derive_vmem_limit():
    try:
        cap = pltpu.get_tpu_info().vmem_capacity_bytes   # 64 MiB v7x, 128 MiB v5e/v6e
    except Exception:
        cap = 64 * 1024 * 1024                           # conservative fallback
    return int(cap * 3 // 4)


_VMEM_LIMIT = _derive_vmem_limit()


def _cparams(sem):
    return pltpu.CompilerParams(dimension_semantics=sem,
                                vmem_limit_bytes=_VMEM_LIMIT)


# ----------------------------- tile pickers -----------------------------

def _pick_tile_m(M):
    # Large sublane tiles: per-grid-step overhead dominates tiny tiles.
    if M <= 512:
        return M
    for t in (512, 256, 128, 64, 32, 16, 8):
        if M % t == 0:
            return t
    return M


def _pick_tile_lane(N, cap=512):
    # Lane (last-dim) tiles must be multiples of 128 (or the full dim).
    if N % 128 != 0:
        return N
    for c in (2048, 1024, 512, 256, 128):
        if c <= cap and N % c == 0:
            return c
    return N


# ----------------------------- Pallas kernels -----------------------------

def _rmsnorm_matmul_kernel(x_ref, nw_ref, w_ref, o_ref, *, eps):
    # o[i, j-tile] = (RMSNorm(x_row_tile) @ W[:, j-tile])   (bf16 out)
    x = x_ref[...].astype(jnp.float32)
    ms = jnp.mean(x * x, axis=-1, keepdims=True)
    xn = ((x * lax.rsqrt(ms + eps)) * nw_ref[...]).astype(jnp.bfloat16)
    o_ref[...] = jnp.dot(xn, w_ref[...],
                         preferred_element_type=jnp.float32).astype(o_ref.dtype)


def _rmsnorm_ffn_residual_kernel(x_ref, nw_ref, w1_ref, w3_ref, w2_ref,
                                 o_ref, acc_ref, *, eps):
    # o = x + w2( silu(RMSNorm(x) @ w1) * (RMSNorm(x) @ w3) )
    # Hidden dim H is a grid reduction axis; partial w2 products accumulate in
    # an f32 VMEM scratch seeded with the residual x.
    k = pl.program_id(1)
    x = x_ref[...].astype(jnp.float32)

    @pl.when(k == 0)
    def _():
        acc_ref[...] = x                              # residual seeded up front

    ms = jnp.mean(x * x, axis=-1, keepdims=True)
    xn = ((x * lax.rsqrt(ms + eps)) * nw_ref[...]).astype(jnp.bfloat16)
    h1 = jnp.dot(xn, w1_ref[...], preferred_element_type=jnp.float32)
    h3 = jnp.dot(xn, w3_ref[...], preferred_element_type=jnp.float32)
    g = (h1 * jax.nn.sigmoid(h1) * h3).astype(jnp.bfloat16)          # silu->EUP
    acc_ref[...] += jnp.dot(g, w2_ref[...], preferred_element_type=jnp.float32)

    @pl.when(k == pl.num_programs(1) - 1)
    def _():
        o_ref[...] = acc_ref[...]


def _sparse_attn_wo_res_kernel(qkv_ref, wo_ref, res_ref, o_ref, acc_ref,
                               *, hd, topk, scale):
    # One (batch, head) pair per grid step.  wo projection + residual add are
    # fused: each head's (S, hd) output is projected by its (hd, D) slice of wo
    # and accumulated into a (S, D) f32 VMEM scratch seeded with the residual.
    # TODO(synk): flash-tile the (S,S) score matrix (two-pass top-k threshold)
    # for large S; the full per-head score matrix is fine at small S.
    head = pl.program_id(1)
    S = o_ref.shape[1]

    @pl.when(head == 0)
    def _():
        acc_ref[...] = res_ref[0]                         # residual

    qkv = qkv_ref[0, 0]                                    # (S, 3*hd) bf16
    q = qkv[:, 0:hd]
    k = qkv[:, hd:2 * hd]
    v = qkv[:, 2 * hd:3 * hd]

    s = lax.dot_general(q, k, (((1,), (1,)), ((), ())),
                        preferred_element_type=jnp.float32) * scale   # (S, S)

    row = lax.broadcasted_iota(jnp.int32, (S, S), 0)
    col = lax.broadcasted_iota(jnp.int32, (S, S), 1)
    # Causal-masked (future) entries get distinct huge-negative values strictly
    # decreasing in column: (a) they behave like -inf in the softmax and
    # (b) they encode the lowest-column tie-break of torch.topk over equal -inf
    # entries directly in the value, so the selection loop below needs only ONE
    # cross-lane (XLU) reduction per iteration.
    masked_val = jnp.float32(-1e30) - col.astype(jnp.float32) * jnp.float32(1e24)
    s_sel = jnp.where(col > row, masked_val, s)

    # torch `zeros_like().scatter(topk)` semantics: exactly `topk` positions per
    # row keep their (possibly -inf-like) score, the rest are zero.  Exact ties
    # between finite scores are measure-zero (torch leaves their order
    # unspecified as well).
    selected = jnp.zeros((S, S), dtype=jnp.bool_)
    cand = s_sel
    neg = jnp.float32(-3e38)
    for _ in range(topk):                                  # small static unroll
        row_max = jnp.max(cand, axis=-1, keepdims=True)    # 1 XLU reduce / iter
        hit = cand == row_max
        selected = jnp.logical_or(selected, hit)
        cand = jnp.where(hit, neg, cand)

    sparse = jnp.where(selected, s_sel, jnp.float32(0.0))

    # softmax over the sparsified scores (non-selected zeros DO contribute,
    # exactly as in the reference); exact division per the correctness review.
    m = jnp.max(sparse, axis=-1, keepdims=True)
    e = jnp.exp(sparse - m)
    p = e / jnp.sum(e, axis=-1, keepdims=True)

    out_h = jnp.dot(p.astype(jnp.bfloat16), v,
                    preferred_element_type=jnp.float32)               # (S, hd)
    acc_ref[...] += jnp.dot(out_h.astype(jnp.bfloat16), wo_ref[0],
                            preferred_element_type=jnp.float32)       # (S, D)

    @pl.when(head == pl.num_programs(1) - 1)
    def _():
        o_ref[0] = acc_ref[...]


def _final_norm_logits_kernel(x_ref, nw_ref, emb_ref, o_ref, *, eps):
    # logits[:, v-tile] = RMSNorm(x_last) @ emb[v-tile, :]^T  (tied weights,
    # contraction over emb dim 1 -> no transposed embedding copy).
    x = x_ref[...].astype(jnp.float32)
    ms = jnp.mean(x * x, axis=-1, keepdims=True)
    xn = ((x * lax.rsqrt(ms + eps)) * nw_ref[...]).astype(jnp.bfloat16)
    o_ref[...] = lax.dot_general(xn, emb_ref[...], (((1,), (1,)), ((), ())),
                                 preferred_element_type=jnp.float32)


# ----------------------------- wrappers -----------------------------

def fused_rmsnorm_matmul(x2d, nw, w_t, eps):
    M, D = x2d.shape
    N = w_t.shape[1]
    tm = _pick_tile_m(M)
    tn = _pick_tile_lane(N, cap=512)
    kern = functools.partial(_rmsnorm_matmul_kernel, eps=eps)
    return pl.pallas_call(
        kern,
        out_shape=jax.ShapeDtypeStruct((M, N), jnp.bfloat16),
        grid=(M // tm, N // tn),
        in_specs=[pl.BlockSpec((tm, D), lambda i, j: (i, 0)),
                  pl.BlockSpec((1, D), lambda i, j: (0, 0)),
                  pl.BlockSpec((D, tn), lambda i, j: (0, j))],
        out_specs=pl.BlockSpec((tm, tn), lambda i, j: (i, j)),
        compiler_params=_cparams(("parallel", "parallel")),
    )(x2d, nw, w_t)


def fused_rmsnorm_ffn_residual(x2d, nw, w1_t, w3_t, w2_t, eps):
    M, D = x2d.shape
    H = w1_t.shape[1]
    tm = _pick_tile_m(M)
    th = _pick_tile_lane(H, cap=512)
    kern = functools.partial(_rmsnorm_ffn_residual_kernel, eps=eps)
    return pl.pallas_call(
        kern,
        out_shape=jax.ShapeDtypeStruct((M, D), jnp.float32),
        grid=(M // tm, H // th),
        in_specs=[pl.BlockSpec((tm, D), lambda i, k: (i, 0)),
                  pl.BlockSpec((1, D), lambda i, k: (0, 0)),
                  pl.BlockSpec((D, th), lambda i, k: (0, k)),
                  pl.BlockSpec((D, th), lambda i, k: (0, k)),
                  pl.BlockSpec((th, D), lambda i, k: (k, 0))],
        out_specs=pl.BlockSpec((tm, D), lambda i, k: (i, 0)),
        scratch_shapes=[pltpu.VMEM((tm, D), jnp.float32)],
        compiler_params=_cparams(("parallel", "arbitrary")),
    )(x2d, nw, w1_t, w3_t, w2_t)


def sparse_attention_wo_residual(qkv_heads, wo_heads, res, topk, scale):
    B, n_heads, S, threehd = qkv_heads.shape
    hd = threehd // 3
    D = wo_heads.shape[-1]
    kern = functools.partial(_sparse_attn_wo_res_kernel,
                             hd=hd, topk=min(topk, S), scale=scale)
    return pl.pallas_call(
        kern,
        out_shape=jax.ShapeDtypeStruct((B, S, D), jnp.float32),
        grid=(B, n_heads),
        in_specs=[pl.BlockSpec((1, 1, S, threehd), lambda b, h: (b, h, 0, 0)),
                  pl.BlockSpec((1, hd, D), lambda b, h: (h, 0, 0)),
                  pl.BlockSpec((1, S, D), lambda b, h: (b, 0, 0))],
        out_specs=pl.BlockSpec((1, S, D), lambda b, h: (b, 0, 0)),
        scratch_shapes=[pltpu.VMEM((S, D), jnp.float32)],
        compiler_params=_cparams(("parallel", "arbitrary")),
    )(qkv_heads, wo_heads, res)


def final_norm_logits(x_last, nw, emb, eps):
    B, D = x_last.shape
    V = emb.shape[0]
    tv = _pick_tile_lane(V, cap=2048)        # multiples of 128 -> also 8-aligned
    kern = functools.partial(_final_norm_logits_kernel, eps=eps)
    return pl.pallas_call(
        kern,
        out_shape=jax.ShapeDtypeStruct((B, V), jnp.float32),
        grid=(V // tv,),
        in_specs=[pl.BlockSpec((B, D), lambda j: (0, 0)),
                  pl.BlockSpec((1, D), lambda j: (0, 0)),
                  pl.BlockSpec((tv, D), lambda j: (j, 0))],
        out_specs=pl.BlockSpec((B, tv), lambda j: (0, j)),
        compiler_params=_cparams(("parallel",)),
    )(x_last, nw, emb)


# ----------------------------- model -----------------------------

def init_params(key, cfg):
    D, V, H = cfg["dim"], cfg["vocab_size"], cfg["hidden_dim"]
    n_layers, n_heads = cfg["n_layers"], cfg["n_heads"]
    hd = D // n_heads
    std = 0.02
    # Reference init: wo.weight and w3.weight get 0.02/sqrt(2*n_layers),
    # everything else (emb, wq/wk/wv, w1, w2) gets 0.02.
    proj_std = 0.02 / math.sqrt(2 * n_layers)
    keys = jax.random.split(key, 1 + 7 * n_layers)
    ki = iter(keys)

    def w(k, shape, s):
        return jax.random.normal(k, shape, jnp.float32) * s

    params = {
        # tied with the output projection; stored in ONE precision (bf16) and
        # used at that precision for both the token gather and the logits.
        "emb": w(next(ki), (V, D), std).astype(jnp.bfloat16),
        "norm_w": jnp.ones((1, D), jnp.float32),
        "layers": [],
    }
    for _ in range(n_layers):
        wq = w(next(ki), (D, D), std)
        wk = w(next(ki), (D, D), std)
        wv = w(next(ki), (D, D), std)
        # Fused QKV weight, pre-transposed to (in, 3*out) and HEAD-INTERLEAVED:
        # last-dim layout [h0:(q,k,v), h1:(q,k,v), ...] so the per-head block
        # for the attention kernel is a plain reshape of the qkv activation.
        blocks = []
        for hh in range(n_heads):
            blocks += [wq[:, hh * hd:(hh + 1) * hd],
                       wk[:, hh * hd:(hh + 1) * hd],
                       wv[:, hh * hd:(hh + 1) * hd]]
        wqkv_t = jnp.concatenate(blocks, axis=1).astype(jnp.bfloat16)

        wo_t = w(next(ki), (D, D), proj_std)                 # (in=D, out=D)
        wo_heads = wo_t.reshape(n_heads, hd, D).astype(jnp.bfloat16)

        params["layers"].append({
            "attn_norm_w": jnp.ones((1, D), jnp.float32),
            "ffn_norm_w": jnp.ones((1, D), jnp.float32),
            "wqkv_t": wqkv_t,
            "wo_heads": wo_heads,
            "w1_t": w(next(ki), (D, H), std).astype(jnp.bfloat16),
            "w3_t": w(next(ki), (D, H), proj_std).astype(jnp.bfloat16),
            "w2_t": w(next(ki), (H, D), std).astype(jnp.bfloat16),
        })
    return params


def make_forward(cfg):
    D = cfg["dim"]
    n_heads = cfg["n_heads"]
    hd = D // n_heads
    eps = cfg["norm_eps"]
    topk = cfg["topk"]
    V = cfg["vocab_size"]
    scale = 1.0 / math.sqrt(hd)

    def fwd(params, tokens):
        B, S = tokens.shape
        # token embedding gather (glue); dropout=0 in the eval path -> identity
        h = jnp.take(params["emb"], tokens, axis=0).astype(jnp.float32)   # (B,S,D)

        for layer in params["layers"]:
            x2 = h.reshape(B * S, D)
            # RMSNorm + fused (head-interleaved) QKV projection, bf16 writeback
            qkv = fused_rmsnorm_matmul(x2, layer["attn_norm_w"],
                                       layer["wqkv_t"], eps)      # (B*S, 3D) bf16
            # producer-side head split -> (B, n_heads, S, 3*hd)
            qkv_heads = qkv.reshape(B, S, n_heads, 3 * hd).transpose(0, 2, 1, 3)
            # sparse (top-k) causal attention; wo + residual fused in-kernel
            h = sparse_attention_wo_residual(qkv_heads, layer["wo_heads"],
                                             h, topk, scale)      # (B, S, D) f32
            # fused RMSNorm + SwiGLU FFN (H-tiled reduction) + residual add
            h = fused_rmsnorm_ffn_residual(h.reshape(B * S, D),
                                           layer["ffn_norm_w"],
                                           layer["w1_t"], layer["w3_t"],
                                           layer["w2_t"], eps).reshape(B, S, D)

        # targets=None path: only the last position is projected; slice BEFORE
        # the final norm (norm is per-position) and use the tied embedding.
        h_last = h[:, -1, :]                                       # (B, D)
        logits = final_norm_logits(h_last, params["norm_w"],
                                   params["emb"], eps)             # (B, V)
        return logits.reshape(B, 1, V)

    return jax.jit(fwd)


# ----------------------------- main -----------------------------

if __name__ == "__main__":
    cfg = {
        "dim": 32,
        "n_layers": 2,
        "n_heads": 4,
        "n_kv_heads": 4,      # == n_heads (module never repeats kv heads)
        "vocab_size": 64,
        "max_seq_len": 16,
        "dropout": 0.0,       # eval path: dropout is identity
        "topk": 4,            # < seq_len so the sparse top-k path is exercised
        "hidden_dim": 48,
        "norm_eps": 1e-6,
    }
    B, S = 2, 8

    key = jax.random.PRNGKey(0)
    kp, kt = jax.random.split(key)
    params = init_params(kp, cfg)
    tokens = jax.random.randint(kt, (B, S), 0, cfg["vocab_size"], dtype=jnp.int32)

    forward = make_forward(cfg)
    logits = forward(params, tokens)
    logits = jax.block_until_ready(logits)
    assert logits.shape == (B, 1, cfg["vocab_size"])
    assert bool(jnp.all(jnp.isfinite(logits)))
    print("KERNEL_OK")
</pallas_src>

<mosaic_0001>
module attributes {stable_mosaic.version = 11 : i64} {
  func.func @_rmsnorm_matmul_kernel(%arg0: i32, %arg1: i32, %arg2: memref<16x32xf32, #tpu.memory_space<vmem>>, %arg3: memref<1x32xf32, #tpu.memory_space<vmem>>, %arg4: memref<32x96xbf16, #tpu.memory_space<vmem>>, %arg5: memref<16x96xbf16, #tpu.memory_space<vmem>>) attributes {dimension_semantics = [#tpu.dimension_semantics<parallel>, #tpu.dimension_semantics<parallel>], iteration_bounds = array<i64: 1, 1>, scalar_prefetch = 0 : i64, scratch_operands = 0 : i64, tpu.core_type = #tpu.core_type<tc>, window_params = [{transform_indices = @transform_0, window_bounds = array<i64: 16, 32>}, {pipeline_mode = #tpu.pipeline_mode<synchronous>, transform_indices = @transform_1, window_bounds = array<i64: 1, 32>}, {transform_indices = @transform_2, window_bounds = array<i64: 32, 96>}, {transform_indices = @transform_3, window_bounds = array<i64: 16, 96>}]} {
    %c0 = arith.constant 0 : index
    %c0_0 = arith.constant 0 : index
    %0 = vector.load %arg2[%c0, %c0_0] : memref<16x32xf32, #tpu.memory_space<vmem>>, vector<16x32xf32>
    %1 = arith.mulf %0, %0 : vector<16x32xf32>
    %cst = arith.constant dense<0.000000e+00> : vector<16xf32>
    %2 = vector.multi_reduction <add>, %1, %cst [1] : vector<16x32xf32> to vector<16xf32>
    %3 = vector.shape_cast %2 : vector<16xf32> to vector<16x1xf32>
    %cst_1 = arith.constant 3.200000e+01 : f32
    %4 = vector.broadcast %cst_1 : f32 to vector<16x1xf32>
    %5 = arith.divf %3, %4 : vector<16x1xf32>
    %cst_2 = arith.constant 9.99999997E-7 : f32
    %6 = vector.broadcast %cst_2 : f32 to vector<16x1xf32>
    %7 = arith.addf %5, %6 : vector<16x1xf32>
    %8 = math.rsqrt %7 : vector<16x1xf32>
    %9 = vector.broadcast %8 : vector<16x1xf32> to vector<16x32xf32>
    %10 = arith.mulf %0, %9 : vector<16x32xf32>
    %c0_3 = arith.constant 0 : index
    %c0_4 = arith.constant 0 : index
    %11 = vector.load %arg3[%c0_3, %c0_4] : memref<1x32xf32, #tpu.memory_space<vmem>>, vector<1x32xf32>
    %12 = vector.broadcast %11 : vector<1x32xf32> to vector<16x32xf32>
    %13 = arith.mulf %10, %12 : vector<16x32xf32>
    %14 = arith.truncf %13 : vector<16x32xf32> to vector<16x32xbf16>
    %c0_5 = arith.constant 0 : index
    %c0_6 = arith.constant 0 : index
    %15 = vector.load %arg4[%c0_5, %c0_6] : memref<32x96xbf16, #tpu.memory_space<vmem>>, vector<32x96xbf16>
    %cst_7 = arith.constant dense<0.000000e+00> : vector<16x96xf32>
    %16 = tpu.matmul %14, %15, %cst_7 {dimension_numbers = #tpu.dot_dimension_numbers<[1], [0], [0], [1], [0, 0, 1, 1], [], []>} : vector<16x32xbf16>, vector<32x96xbf16>, vector<16x96xf32> -> vector<16x96xf32>
    %17 = arith.truncf %16 : vector<16x96xf32> to vector<16x96xbf16>
    %c0_8 = arith.constant 0 : index
    %c0_9 = arith.constant 0 : index
    %18 = vector.load %arg5[%c0_8, %c0_9] : memref<16x96xbf16, #tpu.memory_space<vmem>>, vector<16x96xbf16>
    tpu.vector_store %arg5[%c0_8, %c0_9], %17 {strides = array<i32>} : memref<16x96xbf16, #tpu.memory_space<vmem>>, vector<16x96xbf16>,
    return
  }
  func.func @transform_0(%arg0: i32, %arg1: i32) -> (i32, i32) {
    %c0_i32 = arith.constant 0 : i32
    %c0_i32_0 = arith.constant 0 : i32
    return %arg0, %c0_i32 : i32, i32
  }
  func.func @transform_1(%arg0: i32, %arg1: i32) -> (i32, i32) {
    %c0_i32 = arith.constant 0 : i32
    %c0_i32_0 = arith.constant 0 : i32
    %c0_i32_1 = arith.constant 0 : i32
    return %c0_i32, %c0_i32_0 : i32, i32
  }
  func.func @transform_2(%arg0: i32, %arg1: i32) -> (i32, i32) {
    %c0_i32 = arith.constant 0 : i32
    %c0_i32_0 = arith.constant 0 : i32
    return %c0_i32, %arg1 : i32, i32
  }
  func.func @transform_3(%arg0: i32, %arg1: i32) -> (i32, i32) {
    %c0_i32 = arith.constant 0 : i32
    return %arg0, %arg1 : i32, i32
  }
}

module attributes {stable_mosaic.version = 11 : i64} {
  func.func @_sparse_attn_wo_res_kernel(%arg0: i32, %arg1: i32, %arg2: memref<1x1x8x24xbf16, #tpu.memory_space<vmem>>, %arg3: memref<1x8x32xbf16, #tpu.memory_space<vmem>>, %arg4: memref<1x8x32xf32, #tpu.memory_space<vmem>>, %arg5: memref<1x8x32xf32, #tpu.memory_space<vmem>>, %arg6: memref<8x32xf32, #tpu.memory_space<vmem>>) attributes {dimension_semantics = [#tpu.dimension_semantics<parallel>, #tpu.dimension_semantics<arbitrary>], iteration_bounds = array<i64: 2, 4>, scalar_prefetch = 0 : i64, scratch_operands = 1 : i64, tpu.core_type = #tpu.core_type<tc>, window_params = [{transform_indices = @transform_0, window_bounds = array<i64: 1, 1, 8, 24>}, {transform_indices = @transform_1, window_bounds = array<i64: 1, 8, 32>}, {transform_indices = @transform_2, window_bounds = array<i64: 1, 8, 32>}, {transform_indices = @transform_3, window_bounds = array<i64: 1, 8, 32>}]} {
    %c0_i32 = arith.constant 0 : i32
    %0 = arith.cmpi eq, %arg1, %c0_i32 : i32
    %1 = arith.extui %0 : i1 to i32
    %c0_i32_0 = arith.constant 0 : i32
    %2 = arith.cmpi ne, %1, %c0_i32_0 : i32
    scf.if %2 {
      %c0_27 = arith.constant 0 : index
      %c0_28 = arith.constant 0 : index
      %c0_29 = arith.constant 0 : index
      %70 = vector.load %arg4[%c0_27, %c0_28, %c0_29] : memref<1x8x32xf32, #tpu.memory_space<vmem>>, vector<1x8x32xf32>
      %71 = vector.shape_cast %70 : vector<1x8x32xf32> to vector<8x32xf32>
      %c0_30 = arith.constant 0 : index
      %c0_31 = arith.constant 0 : index
      %72 = vector.load %arg6[%c0_30, %c0_31] : memref<8x32xf32, #tpu.memory_space<vmem>>, vector<8x32xf32>
      tpu.vector_store %arg6[%c0_30, %c0_31], %71 {strides = array<i32>} : memref<8x32xf32, #tpu.memory_space<vmem>>, vector<8x32xf32>,
    } else {
    }
    %c0 = arith.constant 0 : index
    %c0_1 = arith.constant 0 : index
    %c0_2 = arith.constant 0 : index
    %c0_3 = arith.constant 0 : index
    %3 = vector.load %arg2[%c0, %c0_1, %c0_2, %c0_3] : memref<1x1x8x24xbf16, #tpu.memory_space<vmem>>, vector<1x1x8x24xbf16>
    %4 = vector.shape_cast %3 : vector<1x1x8x24xbf16> to vector<8x24xbf16>
    %5 = vector.extract_strided_slice %4 {offsets = [0, 0], sizes = [8, 8], strides = [1, 1]} : vector<8x24xbf16> to vector<8x8xbf16>
    %6 = vector.extract_strided_slice %4 {offsets = [0, 8], sizes = [8, 8], strides = [1, 1]} : vector<8x24xbf16> to vector<8x8xbf16>
    %7 = vector.extract_strided_slice %4 {offsets = [0, 16], sizes = [8, 8], strides = [1, 1]} : vector<8x24xbf16> to vector<8x8xbf16>
    %cst = arith.constant dense<0.000000e+00> : vector<8x8xf32>
    %8 = tpu.matmul %5, %6, %cst {dimension_numbers = #tpu.dot_dimension_numbers<[1], [1], [0], [0], [0, 0, 1, 0], [], []>} : vector<8x8xbf16>, vector<8x8xbf16>, vector<8x8xf32> -> vector<8x8xf32>
    %cst_4 = arith.constant 0.353553385 : f32
    %9 = vector.broadcast %cst_4 : f32 to vector<8x8xf32>
    %10 = arith.mulf %8, %9 : vector<8x8xf32>
    %11 = tpu.iota {dimensions = array<i32: 0>} : vector<8x8xi32>
    %12 = tpu.iota {dimensions = array<i32: 1>} : vector<8x8xi32>
    %13 = arith.sitofp %12 : vector<8x8xi32> to vector<8x8xf32>
    %cst_5 = arith.constant 1.000000e+24 : f32
    %14 = vector.broadcast %cst_5 : f32 to vector<8x8xf32>
    %15 = arith.mulf %13, %14 : vector<8x8xf32>
    %cst_6 = arith.constant -1.000000e+30 : f32
    %16 = vector.broadcast %cst_6 : f32 to vector<8x8xf32>
    %17 = arith.subf %16, %15 : vector<8x8xf32>
    %18 = arith.cmpi sgt, %12, %11 : vector<8x8xi32>
    %19 = arith.select %18, %17, %10 : vector<8x8xi1>, vector<8x8xf32>
    %false = arith.constant false
    %20 = vector.broadcast %false : i1 to vector<8x8xi1>
    %cst_7 = arith.constant dense<0xFF800000> : vector<8xf32>
    %21 = vector.multi_reduction <maximumf>, %19, %cst_7 [1] : vector<8x8xf32> to vector<8xf32>
    %22 = vector.shape_cast %21 : vector<8xf32> to vector<8x1xf32>
    %23 = vector.broadcast %22 : vector<8x1xf32> to vector<8x8xf32>
    %24 = arith.cmpf oeq, %19, %23 : vector<8x8xf32>
    %25 = arith.ori %20, %24 : vector<8x8xi1>
    %cst_8 = arith.constant -3.000000e+38 : f32
    %26 = vector.broadcast %cst_8 : f32 to vector<8x8xf32>
    %27 = arith.select %24, %26, %19 : vector<8x8xi1>, vector<8x8xf32>
    %cst_9 = arith.constant dense<0xFF800000> : vector<8xf32>
    %28 = vector.multi_reduction <maximumf>, %27, %cst_9 [1] : vector<8x8xf32> to vector<8xf32>
    %29 = vector.shape_cast %28 : vector<8xf32> to vector<8x1xf32>
    %30 = vector.broadcast %29 : vector<8x1xf32> to vector<8x8xf32>
    %31 = arith.cmpf oeq, %27, %30 : vector<8x8xf32>
    %32 = arith.ori %25, %31 : vector<8x8xi1>
    %cst_10 = arith.constant -3.000000e+38 : f32
    %33 = vector.broadcast %cst_10 : f32 to vector<8x8xf32>
    %34 = arith.select %31, %33, %27 : vector<8x8xi1>, vector<8x8xf32>
    %cst_11 = arith.constant dense<0xFF800000> : vector<8xf32>
    %35 = vector.multi_reduction <maximumf>, %34, %cst_11 [1] : vector<8x8xf32> to vector<8xf32>
    %36 = vector.shape_cast %35 : vector<8xf32> to vector<8x1xf32>
    %37 = vector.broadcast %36 : vector<8x1xf32> to vector<8x8xf32>
    %38 = arith.cmpf oeq, %34, %37 : vector<8x8xf32>
    %39 = arith.ori %32, %38 : vector<8x8xi1>
    %cst_12 = arith.constant -3.000000e+38 : f32
    %40 = vector.broadcast %cst_12 : f32 to vector<8x8xf32>
    %41 = arith.select %38, %40, %34 : vector<8x8xi1>, vector<8x8xf32>
    %cst_13 = arith.constant dense<0xFF800000> : vector<8xf32>
    %42 = vector.multi_reduction <maximumf>, %41, %cst_13 [1] : vector<8x8xf32> to vector<8xf32>
    %43 = vector.shape_cast %42 : vector<8xf32> to vector<8x1xf32>
    %44 = vector.broadcast %43 : vector<8x1xf32> to vector<8x8xf32>
    %45 = arith.cmpf oeq, %41, %44 : vector<8x8xf32>
    %46 = arith.ori %39, %45 : vector<8x8xi1>
    %cst_14 = arith.constant 0.000000e+00 : f32
    %47 = vector.broadcast %cst_14 : f32 to vector<8x8xf32>
    %48 = arith.select %46, %19, %47 : vector<8x8xi1>, vector<8x8xf32>
    %cst_15 = arith.constant dense<0xFF800000> : vector<8xf32>
    %49 = vector.multi_reduction <maximumf>, %48, %cst_15 [1] : vector<8x8xf32> to vector<8xf32>
    %50 = vector.shape_cast %49 : vector<8xf32> to vector<8x1xf32>
    %51 = vector.broadcast %50 : vector<8x1xf32> to vector<8x8xf32>
    %52 = arith.subf %48, %51 : vector<8x8xf32>
    %53 = math.exp %52 : vector<8x8xf32>
    %cst_16 = arith.constant dense<0.000000e+00> : vector<8xf32>
    %54 = vector.multi_reduction <add>, %53, %cst_16 [1] : vector<8x8xf32> to vector<8xf32>
    %55 = vector.shape_cast %54 : vector<8xf32> to vector<8x1xf32>
    %56 = vector.broadcast %55 : vector<8x1xf32> to vector<8x8xf32>
    %57 = arith.divf %53, %56 : vector<8x8xf32>
    %58 = arith.truncf %57 : vector<8x8xf32> to vector<8x8xbf16>
    %cst_17 = arith.constant dense<0.000000e+00> : vector<8x8xf32>
    %59 = tpu.matmul %58, %7, %cst_17 {dimension_numbers = #tpu.dot_dimension_numbers<[1], [0], [0], [1], [0, 0, 1, 1], [], []>} : vector<8x8xbf16>, vector<8x8xbf16>, vector<8x8xf32> -> vector<8x8xf32>
    %c0_18 = arith.constant 0 : index
    %c0_19 = arith.constant 0 : index
    %60 = vector.load %arg6[%c0_18, %c0_19] : memref<8x32xf32, #tpu.memory_space<vmem>>, vector<8x32xf32>
    %61 = arith.truncf %59 : vector<8x8xf32> to vector<8x8xbf16>
    %c0_20 = arith.constant 0 : index
    %c0_21 = arith.constant 0 : index
    %c0_22 = arith.constant 0 : index
    %62 = vector.load %arg3[%c0_20, %c0_21, %c0_22] : memref<1x8x32xbf16, #tpu.memory_space<vmem>>, vector<1x8x32xbf16>
    %63 = vector.shape_cast %62 : vector<1x8x32xbf16> to vector<8x32xbf16>
    %cst_23 = arith.constant dense<0.000000e+00> : vector<8x32xf32>
    %64 = tpu.matmul %61, %63, %cst_23 {dimension_numbers = #tpu.dot_dimension_numbers<[1], [0], [0], [1], [0, 0, 1, 1], [], []>} : vector<8x8xbf16>, vector<8x32xbf16>, vector<8x32xf32> -> vector<8x32xf32>
    %65 = arith.addf %60, %64 : vector<8x32xf32>
    %c0_24 = arith.constant 0 : index
    %c0_25 = arith.constant 0 : index
    %66 = vector.load %arg6[%c0_24, %c0_25] : memref<8x32xf32, #tpu.memory_space<vmem>>, vector<8x32xf32>
    tpu.vector_store %arg6[%c0_24, %c0_25], %65 {strides = array<i32>} : memref<8x32xf32, #tpu.memory_space<vmem>>, vector<8x32xf32>,
    %c3_i32 = arith.constant 3 : i32
    %67 = arith.cmpi eq, %arg1, %c3_i32 : i32
    %68 = arith.extui %67 : i1 to i32
    %c0_i32_26 = arith.constant 0 : i32
    %69 = arith.cmpi ne, %68, %c0_i32_26 : i32
    scf.if %69 {
      %c0_27 = arith.constant 0 : index
      %c0_28 = arith.constant 0 : index
      %70 = vector.load %arg6[%c0_27, %c0_28] : memref<8x32xf32, #tpu.memory_space<vmem>>, vector<8x32xf32>
      %c0_29 = arith.constant 0 : index
      %c0_30 = arith.constant 0 : index
      %c0_31 = arith.constant 0 : index
      %71 = vector.load %arg5[%c0_29, %c0_30, %c0_31] : memref<1x8x32xf32, #tpu.memory_space<vmem>>, vector<1x8x32xf32>
      %72 = vector.shape_cast %71 : vector<1x8x32xf32> to vector<8x32xf32>
      %73 = vector.shape_cast %70 : vector<8x32xf32> to vector<1x8x32xf32>
      tpu.vector_store %arg5[%c0_29, %c0_30, %c0_31], %73 {strides = array<i32>} : memref<1x8x32xf32, #tpu.memory_space<vmem>>, vector<1x8x32xf32>,
    } else {
    }
    return
  }
  func.func @transform_0(%arg0: i32, %arg1: i32) -> (i32, i32, i32, i32) {
    %c0_i32 = arith.constant 0 : i32
    %c0_i32_0 = arith.constant 0 : i32
    %c0_i32_1 = arith.constant 0 : i32
    return %arg0, %arg1, %c0_i32, %c0_i32_0 : i32, i32, i32, i32
  }
  func.func @transform_1(%arg0: i32, %arg1: i32) -> (i32, i32, i32) {
    %c0_i32 = arith.constant 0 : i32
    %c0_i32_0 = arith.constant 0 : i32
    %c0_i32_1 = arith.constant 0 : i32
    return %arg1, %c0_i32, %c0_i32_0 : i32, i32, i32
  }
  func.func @transform_2(%arg0: i32, %arg1: i32) -> (i32, i32, i32) {
    %c0_i32 = arith.constant 0 : i32
    %c0_i32_0 = arith.constant 0 : i32
    %c0_i32_1 = arith.constant 0 : i32
    return %arg0, %c0_i32, %c0_i32_0 : i32, i32, i32
  }
  func.func @transform_3(%arg0: i32, %arg1: i32) -> (i32, i32, i32) {
    %c0_i32 = arith.constant 0 : i32
    %c0_i32_0 = arith.constant 0 : i32
    %c0_i32_1 = arith.constant 0 : i32
    return %arg0, %c0_i32, %c0_i32_0 : i32, i32, i32
  }
}

module attributes {stable_mosaic.version = 11 : i64} {
  func.func @_rmsnorm_ffn_residual_kernel(%arg0: i32, %arg1: i32, %arg2: memref<16x32xf32, #tpu.memory_space<vmem>>, %arg3: memref<1x32xf32, #tpu.memory_space<vmem>>, %arg4: memref<32x48xbf16, #tpu.memory_space<vmem>>, %arg5: memref<32x48xbf16, #tpu.memory_space<vmem>>, %arg6: memref<48x32xbf16, #tpu.memory_space<vmem>>, %arg7: memref<16x32xf32, #tpu.memory_space<vmem>>, %arg8: memref<16x32xf32, #tpu.memory_space<vmem>>) attributes {dimension_semantics = [#tpu.dimension_semantics<parallel>, #tpu.dimension_semantics<arbitrary>], iteration_bounds = array<i64: 1, 1>, scalar_prefetch = 0 : i64, scratch_operands = 1 : i64, tpu.core_type = #tpu.core_type<tc>, window_params = [{transform_indices = @transform_0, window_bounds = array<i64: 16, 32>}, {pipeline_mode = #tpu.pipeline_mode<synchronous>, transform_indices = @transform_1, window_bounds = array<i64: 1, 32>}, {transform_indices = @transform_2, window_bounds = array<i64: 32, 48>}, {transform_indices = @transform_3, window_bounds = array<i64: 32, 48>}, {transform_indices = @transform_4, window_bounds = array<i64: 48, 32>}, {transform_indices = @transform_5, window_bounds = array<i64: 16, 32>}]} {
    %c0 = arith.constant 0 : index
    %c0_0 = arith.constant 0 : index
    %0 = vector.load %arg2[%c0, %c0_0] : memref<16x32xf32, #tpu.memory_space<vmem>>, vector<16x32xf32>
    %c0_i32 = arith.constant 0 : i32
    %1 = arith.cmpi eq, %arg1, %c0_i32 : i32
    %2 = arith.extui %1 : i1 to i32
    %c0_i32_1 = arith.constant 0 : i32
    %3 = arith.cmpi ne, %2, %c0_i32_1 : i32
    scf.if %3 {
      %c0_22 = arith.constant 0 : index
      %c0_23 = arith.constant 0 : index
      %38 = vector.load %arg8[%c0_22, %c0_23] : memref<16x32xf32, #tpu.memory_space<vmem>>, vector<16x32xf32>
      tpu.vector_store %arg8[%c0_22, %c0_23], %0 {strides = array<i32>} : memref<16x32xf32, #tpu.memory_space<vmem>>, vector<16x32xf32>,
    } else {
    }
    %4 = arith.mulf %0, %0 : vector<16x32xf32>
    %cst = arith.constant dense<0.000000e+00> : vector<16xf32>
    %5 = vector.multi_reduction <add>, %4, %cst [1] : vector<16x32xf32> to vector<16xf32>
    %6 = vector.shape_cast %5 : vector<16xf32> to vector<16x1xf32>
    %cst_2 = arith.constant 3.200000e+01 : f32
    %7 = vector.broadcast %cst_2 : f32 to vector<16x1xf32>
    %8 = arith.divf %6, %7 : vector<16x1xf32>
    %cst_3 = arith.constant 9.99999997E-7 : f32
    %9 = vector.broadcast %cst_3 : f32 to vector<16x1xf32>
    %10 = arith.addf %8, %9 : vector<16x1xf32>
    %11 = math.rsqrt %10 : vector<16x1xf32>
    %12 = vector.broadcast %11 : vector<16x1xf32> to vector<16x32xf32>
    %13 = arith.mulf %0, %12 : vector<16x32xf32>
    %c0_4 = arith.constant 0 : index
    %c0_5 = arith.constant 0 : index
    %14 = vector.load %arg3[%c0_4, %c0_5] : memref<1x32xf32, #tpu.memory_space<vmem>>, vector<1x32xf32>
    %15 = vector.broadcast %14 : vector<1x32xf32> to vector<16x32xf32>
    %16 = arith.mulf %13, %15 : vector<16x32xf32>
    %17 = arith.truncf %16 : vector<16x32xf32> to vector<16x32xbf16>
    %c0_6 = arith.constant 0 : index
    %c0_7 = arith.constant 0 : index
    %18 = vector.load %arg4[%c0_6, %c0_7] : memref<32x48xbf16, #tpu.memory_space<vmem>>, vector<32x48xbf16>
    %cst_8 = arith.constant dense<0.000000e+00> : vector<16x48xf32>
    %19 = tpu.matmul %17, %18, %cst_8 {dimension_numbers = #tpu.dot_dimension_numbers<[1], [0], [0], [1], [0, 0, 1, 1], [], []>} : vector<16x32xbf16>, vector<32x48xbf16>, vector<16x48xf32> -> vector<16x48xf32>
    %c0_9 = arith.constant 0 : index
    %c0_10 = arith.constant 0 : index
    %20 = vector.load %arg5[%c0_9, %c0_10] : memref<32x48xbf16, #tpu.memory_space<vmem>>, vector<32x48xbf16>
    %cst_11 = arith.constant dense<0.000000e+00> : vector<16x48xf32>
    %21 = tpu.matmul %17, %20, %cst_11 {dimension_numbers = #tpu.dot_dimension_numbers<[1], [0], [0], [1], [0, 0, 1, 1], [], []>} : vector<16x32xbf16>, vector<32x48xbf16>, vector<16x48xf32> -> vector<16x48xf32>
    %22 = arith.negf %19 : vector<16x48xf32>
    %23 = math.exp %22 : vector<16x48xf32>
    %cst_12 = arith.constant 1.000000e+00 : f32
    %24 = vector.broadcast %cst_12 : f32 to vector<16x48xf32>
    %25 = arith.addf %24, %23 : vector<16x48xf32>
    %26 = arith.divf %24, %25 : vector<16x48xf32>
    %27 = arith.mulf %19, %26 : vector<16x48xf32>
    %28 = arith.mulf %27, %21 : vector<16x48xf32>
    %29 = arith.truncf %28 : vector<16x48xf32> to vector<16x48xbf16>
    %c0_13 = arith.constant 0 : index
    %c0_14 = arith.constant 0 : index
    %30 = vector.load %arg8[%c0_13, %c0_14] : memref<16x32xf32, #tpu.memory_space<vmem>>, vector<16x32xf32>
    %c0_15 = arith.constant 0 : index
    %c0_16 = arith.constant 0 : index
    %31 = vector.load %arg6[%c0_15, %c0_16] : memref<48x32xbf16, #tpu.memory_space<vmem>>, vector<48x32xbf16>
    %cst_17 = arith.constant dense<0.000000e+00> : vector<16x32xf32>
    %32 = tpu.matmul %29, %31, %cst_17 {dimension_numbers = #tpu.dot_dimension_numbers<[1], [0], [0], [1], [0, 0, 1, 1], [], []>} : vector<16x48xbf16>, vector<48x32xbf16>, vector<16x32xf32> -> vector<16x32xf32>
    %33 = arith.addf %30, %32 : vector<16x32xf32>
    %c0_18 = arith.constant 0 : index
    %c0_19 = arith.constant 0 : index
    %34 = vector.load %arg8[%c0_18, %c0_19] : memref<16x32xf32, #tpu.memory_space<vmem>>, vector<16x32xf32>
    tpu.vector_store %arg8[%c0_18, %c0_19], %33 {strides = array<i32>} : memref<16x32xf32, #tpu.memory_space<vmem>>, vector<16x32xf32>,
    %c0_i32_20 = arith.constant 0 : i32
    %35 = arith.cmpi eq, %arg1, %c0_i32_20 : i32
    %36 = arith.extui %35 : i1 to i32
    %c0_i32_21 = arith.constant 0 : i32
    %37 = arith.cmpi ne, %36, %c0_i32_21 : i32
    scf.if %37 {
      %c0_22 = arith.constant 0 : index
      %c0_23 = arith.constant 0 : index
      %38 = vector.load %arg8[%c0_22, %c0_23] : memref<16x32xf32, #tpu.memory_space<vmem>>, vector<16x32xf32>
      %c0_24 = arith.constant 0 : index
      %c0_25 = arith.constant 0 : index
      %39 = vector.load %arg7[%c0_24, %c0_25] : memref<16x32xf32, #tpu.memory_space<vmem>>, vector<16x32xf32>
      tpu.vector_store %arg7[%c0_24, %c0_25], %38 {strides = array<i32>} : memref<16x32xf32, #tpu.memory_space<vmem>>, vector<16x32xf32>,
    } else {
    }
    return
  }
  func.func @transform_0(%arg0: i32, %arg1: i32) -> (i32, i32) {
    %c0_i32 = arith.constant 0 : i32
    %c0_i32_0 = arith.constant 0 : i32
    return %arg0, %c0_i32 : i32, i32
  }
  func.func @transform_1(%arg0: i32, %arg1: i32) -> (i32, i32) {
    %c0_i32 = arith.constant 0 : i32
    %c0_i32_0 = arith.constant 0 : i32
    %c0_i32_1 = arith.constant 0 : i32
    return %c0_i32, %c0_i32_0 : i32, i32
  }
  func.func @transform_2(%arg0: i32, %arg1: i32) -> (i32, i32) {
    %c0_i32 = arith.constant 0 : i32
    %c0_i32_0 = arith.constant 0 : i32
    return %c0_i32, %arg1 : i32, i32
  }
  func.func @transform_3(%arg0: i32, %arg1: i32) -> (i32, i32) {
    %c0_i32 = arith.constant 0 : i32
    %c0_i32_0 = arith.constant 0 : i32
    return %c0_i32, %arg1 : i32, i32
  }
  func.func @transform_4(%arg0: i32, %arg1: i32) -> (i32, i32) {
    %c0_i32 = arith.constant 0 : i32
    %c0_i32_0 = arith.constant 0 : i32
    return %arg1, %c0_i32 : i32, i32
  }
  func.func @transform_5(%arg0: i32, %arg1: i32) -> (i32, i32) {
    %c0_i32 = arith.constant 0 : i32
    %c0_i32_0 = arith.constant 0 : i32
    return %arg0, %c0_i32 : i32, i32
  }
}

module attributes {stable_mosaic.version = 11 : i64} {
  func.func @_final_norm_logits_kernel(%arg0: i32, %arg1: memref<2x32xf32, #tpu.memory_space<vmem>>, %arg2: memref<1x32xf32, #tpu.memory_space<vmem>>, %arg3: memref<64x32xbf16, #tpu.memory_space<vmem>>, %arg4: memref<2x64xf32, #tpu.memory_space<vmem>>) attributes {dimension_semantics = [#tpu.dimension_semantics<parallel>], iteration_bounds = array<i64: 1>, scalar_prefetch = 0 : i64, scratch_operands = 0 : i64, tpu.core_type = #tpu.core_type<tc>, window_params = [{pipeline_mode = #tpu.pipeline_mode<synchronous>, transform_indices = @transform_0, window_bounds = array<i64: 2, 32>}, {pipeline_mode = #tpu.pipeline_mode<synchronous>, transform_indices = @transform_1, window_bounds = array<i64: 1, 32>}, {transform_indices = @transform_2, window_bounds = array<i64: 64, 32>}, {transform_indices = @transform_3, window_bounds = array<i64: 2, 64>}]} {
    %c0 = arith.constant 0 : index
    %c0_0 = arith.constant 0 : index
    %0 = vector.load %arg1[%c0, %c0_0] : memref<2x32xf32, #tpu.memory_space<vmem>>, vector<2x32xf32>
    %1 = arith.mulf %0, %0 : vector<2x32xf32>
    %cst = arith.constant dense<0.000000e+00> : vector<2xf32>
    %2 = vector.multi_reduction <add>, %1, %cst [1] : vector<2x32xf32> to vector<2xf32>
    %3 = vector.shape_cast %2 : vector<2xf32> to vector<2x1xf32>
    %cst_1 = arith.constant 3.200000e+01 : f32
    %4 = vector.broadcast %cst_1 : f32 to vector<2x1xf32>
    %5 = arith.divf %3, %4 : vector<2x1xf32>
    %cst_2 = arith.constant 9.99999997E-7 : f32
    %6 = vector.broadcast %cst_2 : f32 to vector<2x1xf32>
    %7 = arith.addf %5, %6 : vector<2x1xf32>
    %8 = math.rsqrt %7 : vector<2x1xf32>
    %9 = vector.broadcast %8 : vector<2x1xf32> to vector<2x32xf32>
    %10 = arith.mulf %0, %9 : vector<2x32xf32>
    %c0_3 = arith.constant 0 : index
    %c0_4 = arith.constant 0 : index
    %11 = vector.load %arg2[%c0_3, %c0_4] : memref<1x32xf32, #tpu.memory_space<vmem>>, vector<1x32xf32>
    %12 = vector.broadcast %11 : vector<1x32xf32> to vector<2x32xf32>
    %13 = arith.mulf %10, %12 : vector<2x32xf32>
    %14 = arith.truncf %13 : vector<2x32xf32> to vector<2x32xbf16>
    %c0_5 = arith.constant 0 : index
    %c0_6 = arith.constant 0 : index
    %15 = vector.load %arg3[%c0_5, %c0_6] : memref<64x32xbf16, #tpu.memory_space<vmem>>, vector<64x32xbf16>
    %cst_7 = arith.constant dense<0.000000e+00> : vector<2x64xf32>
    %16 = tpu.matmul %14, %15, %cst_7 {dimension_numbers = #tpu.dot_dimension_numbers<[1], [1], [0], [0], [0, 0, 1, 0], [], []>} : vector<2x32xbf16>, vector<64x32xbf16>, vector<2x64xf32> -> vector<2x64xf32>
    %c0_8 = arith.constant 0 : index
    %c0_9 = arith.constant 0 : index
    %17 = vector.load %arg4[%c0_8, %c0_9] : memref<2x64xf32, #tpu.memory_space<vmem>>, vector<2x64xf32>
    tpu.vector_store %arg4[%c0_8, %c0_9], %16 {strides = array<i32>} : memref<2x64xf32, #tpu.memory_space<vmem>>, vector<2x64xf32>,
    return
  }
  func.func @transform_0(%arg0: i32) -> (i32, i32) {
    %c0_i32 = arith.constant 0 : i32
    %c0_i32_0 = arith.constant 0 : i32
    %c0_i32_1 = arith.constant 0 : i32
    return %c0_i32, %c0_i32_0 : i32, i32
  }
  func.func @transform_1(%arg0: i32) -> (i32, i32) {
    %c0_i32 = arith.constant 0 : i32
    %c0_i32_0 = arith.constant 0 : i32
    %c0_i32_1 = arith.constant 0 : i32
    return %c0_i32, %c0_i32_0 : i32, i32
  }
  func.func @transform_2(%arg0: i32) -> (i32, i32) {
    %c0_i32 = arith.constant 0 : i32
    %c0_i32_0 = arith.constant 0 : i32
    return %arg0, %c0_i32 : i32, i32
  }
  func.func @transform_3(%arg0: i32) -> (i32, i32) {
    %c0_i32 = arith.constant 0 : i32
    %c0_i32_0 = arith.constant 0 : i32
    return %c0_i32, %arg0 : i32, i32
  }
}

</mosaic_0001>

<bundles_post_ra>
// kernel: fwd.8
= control target key start
LH: loop header
LB: loop body
LE: loop exit
PB: predicated region body
PF: predicated region fallthrough
CT: control target
= control target key end

     0   :  { %s590_s12 = smov 0   ;;  %s592_s13 = smov 0   ;;  %s671_s0 = inlined_call_operand.vmem [shape: bf16[2,4,8,24], index: 0, kind: input, shape index: {}]   ;;  %s672_s1 = inlined_call_operand.vmem [shape: bf16[4,8,32], index: 1, kind: input, shape index: {}]   ;;  %s673_s2 = inlined_call_operand.vmem [shape: f32[2,8,32], index: 2, kind: input, shape index: {}]   ;;  %s674_s3 = inlined_call_operand.vmem [shape: f32[2,8,32], index: 3, kind: output, shape index: {}]  }
   0x1   :  { %s594_s14 = smov 0   ;;  %s596_s15 = smov 0  }
   0x2   :  { %s598_s16 = smov 0  }
   0x3 LB: > { %s22_s17 = sadd.s32 1, %s558_s14  ;;  %s25_s18 = sadd.s32 1, %s562_s15  ;;  %s566_s16 = sphi %s598_s16, %s13_s16   ;;  %s562_s15 = sphi %s596_s15, %s678_s15   ;;  %s558_s14 = sphi %s594_s14, %s677_s14   ;;  %s554_s13 = sphi %s592_s13, %s676_s13   ;;  %s550_s12 = sphi %s590_s12, %s675_s12  }
   0x4   : > { %p23_p0 = scmp.ge.s32.totalorder %s22_s17, 4  ;;  %p469_p1 = scmp.ge.s32.totalorder %s566_s16, 1 }
   0x5   : > { %p172_p2 = scmp.lt.s32.totalorder %s566_s16, 9 }
   0x6   : > { %s680_s17 = smov (%p23_p0, %s22_s17), 0  ;;  %s682_s18 = smov (!%p23_p0, %s25_s18), %s562_s15 }
   0x7   : > { %p173_p3 = pnand %p469_p1, %p172_p2  ;;  %p27_p4 = scmp.ge.s32.totalorder %s682_s18, 2 }
   0x8   : > { %p206_p5 = scmp.lt.s32.totalorder (!%p173_p3), %s554_s13, 1  ;;  %p208_p6 = scmp.lt.s32.totalorder (!%p173_p3), %s550_s12, 3 }
   0x9   : > { %s684_s18 = smov (%p27_p4, %s682_s18), 0  ;;  %176 = sbr.rel (%p173_p3) target bundleno = 1298 (0x512), region = 32 }
   0xa   : > { %p475_p7 = scmp.ne.s32.totalorder (!%p173_p3), %s550_s12, 0 }
   0xe   : > { %s686_s13 = smov (!%p206_p5, %s554_s13), 1 }
   0xf   : > { %s209_s19 = scalar_select %p208_p6, %s550_s12, 3 }
  0x10   : > { %s470_s20 = sshll.u32 %s686_s13, 2  ;;  %s473_s21 = sshll.u32 %s686_s13, 3 }
  0x11   : > { %s211_s22 = sadd.s32 %s470_s20, %s209_s19  ;;  %s472_s23 = sshll.u32 %s209_s19, 2 }
  0x12   : > { %s471_s24 = sshll.u32 %s211_s22, 2  ;;  %s627_s27 = scalar_lea.vmem %s672_s1, %s472_s23 }
  0x13   : > { %s213_s30 = scalar_lea.vmem %s671_s0, %s471_s24  ;;  %s221_s6 = scalar_lea.vmem %s673_s2, %s473_s21 }
  0x14   : > { %s638_s9 = scalar_lea.vmem %s674_s3, %s473_s21  ;;  %230 = sbr.rel (%p475_p7) target bundleno = 27 (0x1b), region = 36 }
  0x19   : > { %v231_v0 = vld [vmem:[%s221_s6] sm:$0xff]  ;;  %vm232_vm0 = vcmask 261120  }
  0x1a   : > { %233 = vst.msk [vmem:[#allocation2] sm:$0xff] %vm232_vm0, %v231_v0 }
  0x1b PF: > { %v234_v1 = vld [vmem:[%s213_s30] sm:$0xf]  ;;  %s568_s10 = smov 120   ;;  %vm240_vm1 = vcmask 64512   ;;  %v261_v6 = vlaneseq  ;;  %s569_s11 = smov 112   ;;  %vm323_vm10 = vcmask 1043456  }
  0x1c   : > { %v236_v2 = vunpack.c.l.b16 %v234_v1  ;;  %v342_v49 = vld [vmem:[%s627_s27] sm:$0xf]  ;;  %vm363_vm15 = vcmask 261120   ;;  %p479_p8 = scmp.ne.s32.totalorder %s550_s12, 3 }
  0x1d   : > { %v264_v7 = vand.u32 127, %v261_v6  ;;  %v262_v10 = vshrl.u32 %v261_v6, 7  ;;  %v347_v50 = vsel %vm323_vm10, %v342_v49, 0 }
  0x1e   : > { %v237_v3 = vpack.c.b16 %v236_v2, %v236_v2  ;;  %356 = vmatpush.bf16.msra.mxu2 %v347_v50 }
  0x1f   : > { %v265_v8 = vcvt.s32.f32 %v264_v7  ;;  %vm268_vm2 = vcmp.gt.s32.totalorder %v264_v7, %v262_v10 }
  0x20   : > { %238 = vrot.lane.b32.xlu0 %v237_v3, %s568_s10 }
  0x21   : > { %v266_v9 = vmul.f32 1e+24, %v265_v8  ;;  %v340_v54 = vld [vmem:[#allocation2] sm:$0xff] }
  0x23   : > { %v267_v11 = vsub.f32 -1e+30, %v266_v9 }
  0x92   : > { %v239_v4 = vpop.permute.xlu0 %238 }
  0x93   : > { %v245_v5 = vsel %vm240_vm1, %v239_v4, 0 }
  0x94   : > { %254 = vmatpush.bf16.xpose.msra.mxu0 %v245_v5 }
  0x9b   : > { %476 = vmatmul.msk.bf16.vlgmr.msra.gmra.mxu0 %vm240_vm1, %v234_v1 }
 0x118   : > { %v256_v12 = vpop.f32.mrf.mxu0 }
 0x119   : > { %v260_v13 = vmul.f32 0.35355338, %v256_v12 }
 0x11b   : > { %v269_v14 = vsel %vm268_vm2, %v267_v11, %v260_v13 }
 0x11c   : > { %v270_v15 = vsel %vm240_vm1, %v269_v14, -inf }
 0x11d   : > { %271 = vmax.xlane.f32.xlu0 %v270_v15 }
 0x120   : > { %v258_v16 = vpop.f32.mrf.mxu0 }
 0x190   : > { %v272_v17 = vpop.xlane.xlu0 %271 }
 0x191   : > { %vm273_vm3 = vcmp.eq.f32.partialorder %v269_v14, %v272_v17 }
 0x192   : > { %v274_v18 = vsel %vm273_vm3, -3e+38, %v269_v14 }
 0x193   : > { %v275_v19 = vsel %vm240_vm1, %v274_v18, -inf }
 0x194   : > { %276 = vmax.xlane.f32.xlu1 %v275_v19 }
 0x207   : > { %v277_v20 = vpop.xlane.xlu1 %276 }
 0x208   : > { %vm278_vm4 = vcmp.eq.f32.partialorder %v274_v18, %v277_v20 }
 0x209   : > { %v280_v21 = vsel %vm278_vm4, -3e+38, %v274_v18  ;;  %vm279_vm5 = vmor %vm273_vm3, %vm278_vm4 }
 0x20a   : > { %v281_v22 = vsel %vm240_vm1, %v280_v21, -inf }
 0x20b   : > { %282 = vmax.xlane.f32.xlu1 %v281_v22 }
 0x27e   : > { %v283_v23 = vpop.xlane.xlu1 %282 }
 0x27f   : > { %vm284_vm6 = vcmp.eq.f32.partialorder %v280_v21, %v283_v23 }
 0x280   : > { %vm285_vm7 = vmor %vm279_vm5, %vm284_vm6  ;;  %v286_v24 = vsel %vm284_vm6, -3e+38, %v280_v21 }
 0x281   : > { %v287_v25 = vsel %vm240_vm1, %v286_v24, -inf }
 0x282   : > { %288 = vmax.xlane.f32.xlu2 %v287_v25 }
 0x2f5   : > { %v289_v26 = vpop.xlane.xlu2 %288 }
 0x2f6   : > { %vm290_vm8 = vcmp.eq.f32.partialorder %v286_v24, %v289_v26 }
 0x2f7   : > { %vm291_vm9 = vmor %vm285_vm7, %vm290_vm8 }
 0x2f8   : > { %v292_v27 = vsel %vm291_vm9, %v269_v14, 0.0 }
 0x2f9   : > { %v293_v28 = vsel %vm240_vm1, %v292_v27, -inf }
 0x2fa   : > { %294 = vmax.xlane.f32.xlu2 %v293_v28 }
 0x312   : > { %318 = vrot.lane.b32.xlu2 %v237_v3, %s569_s11 }
 0x36d   : > { %v295_v29 = vpop.xlane.xlu2 %294 }
 0x36e   : > { %v296_v30 = vsub.f32 %v292_v27, %v295_v29 }
 0x370   : > { %v297_v31 = vmul.f32 1.442695, %v296_v30 }
 0x372   : > { %524 = vpow2.f32 %v297_v31 }
 0x375   : > { %v319_v34 = vpop.permute.xlu2 %318 }
 0x376   : > { %v325_v35 = vsel %vm323_vm10, %v319_v34, 0 }
 0x377   : > { %334 = vmatpush.bf16.msra.mxu1 %v325_v35 }
 0x378   : > { %v525_v32 = vpop.eup %524 }
 0x379   : > { %v299_v33 = vsel %vm240_vm1, %v525_v32, 0.0 }
 0x37a   : > { %300 = vadd.xlane.f32.xlu1 %v299_v33 }
 0x3ed   : > { %v301_v36 = vpop.xlane.xlu1 %300 }
 0x3ee   : > { %526 = vrcp.f32 %v301_v36  ;;  %v313_v40 = vand.u32 2147483648, %v301_v36  ;;  %v311_v42 = vand.u32 2147483647, %v301_v36  ;;  %vm307_vm12 = vweird.f32 %v301_v36 }
 0x3f0   : > { %v314_v44 = vor.u32 1.1754944e-38, %v313_v40  ;;  %vm312_vm14 = vcmp.eq.f32.partialorder %v311_v42, 8.507059e+37 }
 0x3f4   : > { %v527_v37 = vpop.eup %526 }
 0x3f5   : > { %v303_v38 = vmul.f32 %v527_v37, %v301_v36  ;;  %vm308_vm11 = vweird.f32 %v527_v37 }
 0x3f6   : > { %vm309_vm13 = vmor %vm307_vm12, %vm308_vm11 }
 0x3f7   : > { %v304_v39 = vsub.f32 1.0, %v303_v38 }
 0x3f9   : > { %v305_v41 = vmul.f32 %v527_v37, %v304_v39 }
 0x3fb   : > { %v306_v43 = vadd.f32 %v527_v37, %v305_v41 }
 0x3fd   : > { %v310_v45 = vsel %vm309_vm13, %v527_v37, %v306_v43 }
 0x3fe   : > { %v315_v46 = vsel %vm312_vm14, %v314_v44, %v310_v45 }
 0x3ff   : > { %v316_v47 = vmul.f32 %v525_v32, %v315_v46 }
 0x401   : > { %v317_v48 = vpack.c.bf16 %v316_v47, %v316_v47 }
 0x403   : > { %477 = vmatmul.msk.bf16.vlgmr.msra.gmra.mxu1 %vm240_vm1, %v317_v48 }
 0x480   : > { %v336_v51 = vpop.f32.mrf.mxu1 }
 0x481   : > { %v341_v52 = vpack.c.bf16 %v336_v51, %v336_v51 }
 0x483   : > { %478 = vmatmul.msk.bf16.vlgmr.msra.gmra.mxu2 %vm240_vm1, %v341_v52 }
 0x488   : > { %v338_v53 = vpop.f32.mrf.mxu1 }
 0x506   : > { %v358_v55 = vpop.f32.mrf.mxu2 }
 0x507   : > { %v362_v56 = vadd.f32 %v358_v55, %v340_v54 }
 0x509   : > { %364 = vst.msk [vmem:[#allocation2] sm:$0xff] %vm363_vm15, %v362_v56 }
 0x50a   : > { %368 = sbr.rel (%p479_p8) target bundleno = 1298 (0x512), region = 40 }
 0x50e   : > { %v360_v57 = vpop.f32.mrf.mxu2 }
 0x510   : > { %v369_v58 = vld [vmem:[#allocation2] sm:$0xff] }
 0x511   : > { %370 = vst.msk [vmem:[%s638_s9] sm:$0xff] %vm363_vm15, %v369_v58 }
 0x512 PF: > { %s13_s16 = sadd.s32 1, %s566_s16   ;;  %s675_s12 = smov %s558_s14 }
 0x513   : > { %p10_p9 = scmp.ge.s32.totalorder %s13_s16, 10   ;;  %s676_s13 = smov %s562_s15 }
 0x514   : > { %s677_s14 = smov %s680_s17  ;;  %s678_s15 = smov %s684_s18 }
 0x515   :  { %12 = sbr.rel (!%p10_p9) target bundleno = 3 (0x3), region = 76 }

// kernel: fwd.13
= control target key start
LH: loop header
LB: loop body
LE: loop exit
PB: predicated region body
PF: predicated region fallthrough
CT: control target
= control target key end

     0   :  { %vm18_vm0 = vcmask 254976   ;;  %vm76_vm1 = vcmask 261120   ;;  %s225_s0 = inlined_call_operand.vmem [shape: f32[2,32], index: 0, kind: input, shape index: {}]   ;;  %s226_s1 = inlined_call_operand.vmem [shape: f32[1,32], index: 1, kind: input, shape index: {}]   ;;  %s227_s2 = inlined_call_operand.vmem [shape: bf16[64,32], index: 2, kind: input, shape index: {}]   ;;  %s228_s3 = inlined_call_operand.hbm [shape: f32[2,64], index: 3, kind: output, shape index: {}]  }
   0x1   :  { %v16_v0 = vld [vmem:[%s225_s0] sm:$0x3]  ;;  %v143_v1 = vld [vmem:[%s227_s2 + $0x18] sm:$0xff] }
   0x2   :  { %v17_v2 = vmul.f32 %v16_v0, %v16_v0 }
   0x3   :  { %8 = vsyncpa [#allocation3], 0  ;;  %v90_v3 = vsel %vm76_vm1, %v143_v1, 0  ;;  %v142_v5 = vld [vmem:[%s227_s2 + $0x10] sm:$0xff]  ;;  %v177_v6 = vmov 32.0   ;;  %v141_v9 = vld [vmem:[%s227_s2 + $0x8] sm:$0xff] }
   0x4   :  { %v19_v4 = vsel %vm18_vm0, %v17_v2, 0.0  ;;  %96 = vmatpush.bf16.xpose.msra.mxu0 %v90_v3  ;;  %147 = vrcp.f32 %v177_v6  ;;  %v87_v7 = vsel %vm76_vm1, %v142_v5, 0  ;;  %v84_v10 = vsel %vm76_vm1, %v141_v9, 0  ;;  %v140_v13 = vld [vmem:[%s227_s2] sm:$0xff]  ;;  %s178_s22 = smov [#allocation2]   ;;  %s114_s26 = sshll.u32 %s228_s3, 4  ;;  %s115_s26 = int_to_ptr.hbm [resolvable:$true] %s114_s26 }
   0x5   :  { %20 = vadd.xlane.f32.xlu0 %v19_v4  ;;  %v81_v14 = vsel %vm76_vm1, %v140_v13, 0  ;;  %v146_v27 = vld [vmem:[%s226_s1] ss:$0 sm:$0xff]  ;;  %s112_s23 = sshll.u32 %s178_s22, 4  ;;  %vm105_vm6 = vcmask 517120   ;;  %s113_s23 = int_to_ptr.vmem [resolvable:$true] %s112_s23 }
   0xa   :  { %v148_v8 = vpop.eup %147 }
   0xb   :  { %v23_v11 = vmul.f32 32.0, %v148_v8  ;;  %vm27_vm2 = vweird.f32 %v148_v8 }
   0xc   :  { %97 = vmatpush.bf16.xpose.msra.mxu0 %v87_v7 }
   0xd   :  { %v24_v12 = vsub.f32 1.0, %v23_v11 }
   0xf   :  { %v25_v15 = vmul.f32 %v148_v8, %v24_v12 }
  0x11   :  { %v26_v16 = vadd.f32 %v148_v8, %v25_v15 }
  0x13   :  { %v28_v17 = vsel %vm27_vm2, %v148_v8, %v26_v16 }
  0x14   :  { %98 = vmatpush.bf16.xpose.msra.mxu0 %v84_v10 }
  0x1c   :  { %99 = vmatpush.bf16.xpose.msra.mxu0 %v81_v14 }
  0x78   :  { %v21_v18 = vpop.xlane.xlu0 %20 }
  0x79   :  { %v29_v19 = vmul.f32 %v28_v17, %v21_v18 }
  0x7b   :  { %v30_v20 = vadd.f32 1e-06, %v29_v19 }
  0x7d   :  { %149 = vrsqrt.f32 %v30_v20  ;;  %vm37_vm4 = vweird.f32 %v30_v20 }
  0x83   :  { %v150_v21 = vpop.eup %149 }
  0x84   :  { %v32_v22 = vmul.f32 %v150_v21, %v30_v20  ;;  %vm38_vm3 = vweird.f32 %v150_v21 }
  0x85   :  { %vm39_vm5 = vmor %vm37_vm4, %vm38_vm3 }
  0x86   :  { %v33_v23 = vmul.f32 %v150_v21, %v32_v22 }
  0x88   :  { %v34_v24 = vmul.f32 0.5, %v33_v23 }
  0x8a   :  { %v35_v25 = vsub.f32 1.5, %v34_v24 }
  0x8c   :  { %v36_v26 = vmul.f32 %v150_v21, %v35_v25 }
  0x8e   :  { %v40_v28 = vsel %vm39_vm5, %v150_v21, %v36_v26 }
  0x8f   :  { %v41_v29 = vmul.f32 %v40_v28, %v16_v0 }
  0x91   :  { %v46_v30 = vmul.f32 %v146_v27, %v41_v29 }
  0x93   :  { %v47_v31 = vpack.c.bf16 %v46_v30, %v46_v30 }
  0x95   :  { %139 = vmatmul.msk.bf16.vlgmr.msra.gmra.mxu0 %vm76_vm1, %v47_v31 }
 0x112   :  { %v101_v32 = vpop.f32.mrf.mxu0 }
 0x113   :  { %106 = vst.msk [vmem:[#allocation2] sm:$0x3] %vm105_vm6, %v101_v32 }
 0x114   :  { %117 = dma.vmem_to_hbm [thread:$0]  %s113_s23, 32, %s115_s26, [#allocation3]  }
 0x11a   :  { %v103_v33 = vpop.f32.mrf.mxu0 }
 0x11b   :  { %175 = dma.done.wait [#allocation3], 32  }
 0x11c   :  { %176 = vsyncadd [#allocation3], 4294967264 }
 0x11d   :  { %122 = vsyncpa [#allocation3], 1 }

// kernel: fwd.7
= control target key start
LH: loop header
LB: loop body
LE: loop exit
PB: predicated region body
PF: predicated region fallthrough
CT: control target
= control target key end

     0   :  { %vm19_vm0 = vcmask 261120   ;;  %v127_v6 = vmov 32.0   ;;  %vm101_vm8 = vcmask 781312   ;;  %s172_s0 = inlined_call_operand.vmem [shape: f32[16,32], index: 0, kind: input, shape index: {}]   ;;  %s173_s1 = inlined_call_operand.vmem [shape: f32[1,32], index: 1, kind: input, shape index: {}]   ;;  %s174_s2 = inlined_call_operand.vmem [shape: bf16[32,96], index: 2, kind: input, shape index: {}]   ;;  %s175_s3 = inlined_call_operand.vmem [shape: bf16[16,96], index: 3, kind: output, shape index: {}]  }
   0x1   :  { %v15_v0 = vld [vmem:[%s172_s0] sm:$0xff]  ;;  %v16_v2 = vld [vmem:[%s172_s0 + $0x8] sm:$0xff]  ;;  %121 = vrcp.f32 %v127_v6 }
   0x2   :  { %v17_v1 = vmul.f32 %v15_v0, %v15_v0  ;;  %v18_v4 = vmul.f32 %v16_v2, %v16_v2  ;;  %v118_v12 = vld [vmem:[%s174_s2 + $0x8] sm:$0xff]  ;;  %v117_v14 = vld [vmem:[%s174_s2] sm:$0xff] }
   0x3   :  { %91 = vmatpush.bf16.msra.mxu0 %v118_v12  ;;  %v120_v35 = vld [vmem:[%s173_s1] ss:$0 sm:$0xff] }
   0x4   :  { %v20_v3 = vsel %vm19_vm0, %v17_v1, 0.0  ;;  %v23_v5 = vsel %vm19_vm0, %v18_v4, 0.0 }
   0x5   :  { %21 = vadd.xlane.f32.xlu0 %v20_v3 }
   0x7   :  { %v122_v7 = vpop.eup %121  ;;  %92 = vmatpush.bf16.msra.mxu0 %v117_v14 }
   0x8   :  { %v27_v8 = vmul.f32 32.0, %v122_v7  ;;  %vm31_vm1 = vweird.f32 %v122_v7 }
   0xa   :  { %v28_v9 = vsub.f32 1.0, %v27_v8 }
   0xc   :  { %v29_v10 = vmul.f32 %v122_v7, %v28_v9 }
   0xd   :  { %24 = vadd.xlane.f32.xlu0 %v23_v5 }
   0xe   :  { %v30_v11 = vadd.f32 %v122_v7, %v29_v10 }
  0x10   :  { %v32_v13 = vsel %vm31_vm1, %v122_v7, %v30_v11 }
  0x78   :  { %v22_v15 = vpop.xlane.xlu0 %21 }
  0x79   :  { %v33_v16 = vmul.f32 %v32_v13, %v22_v15 }
  0x7b   :  { %v35_v17 = vadd.f32 1e-06, %v33_v16 }
  0x7d   :  { %123 = vrsqrt.f32 %v35_v17  ;;  %vm43_vm3 = vweird.f32 %v35_v17 }
  0x80   :  { %v25_v18 = vpop.xlane.xlu0 %24 }
  0x81   :  { %v34_v19 = vmul.f32 %v32_v13, %v25_v18 }
  0x83   :  { %v124_v20 = vpop.eup %123  ;;  %v36_v21 = vadd.f32 1e-06, %v34_v19 }
  0x84   :  { %v38_v22 = vmul.f32 %v124_v20, %v35_v17  ;;  %vm44_vm2 = vweird.f32 %v124_v20 }
  0x85   :  { %125 = vrsqrt.f32 %v36_v21  ;;  %vm45_vm4 = vmor %vm43_vm3, %vm44_vm2  ;;  %vm53_vm6 = vweird.f32 %v36_v21 }
  0x86   :  { %v39_v23 = vmul.f32 %v124_v20, %v38_v22 }
  0x88   :  { %v40_v24 = vmul.f32 0.5, %v39_v23 }
  0x8a   :  { %v41_v25 = vsub.f32 1.5, %v40_v24 }
  0x8b   :  { %v126_v26 = vpop.eup %125 }
  0x8c   :  { %v48_v27 = vmul.f32 %v126_v26, %v36_v21  ;;  %v42_v28 = vmul.f32 %v124_v20, %v41_v25  ;;  %vm54_vm5 = vweird.f32 %v126_v26 }
  0x8d   :  { %vm55_vm7 = vmor %vm53_vm6, %vm54_vm5 }
  0x8e   :  { %v49_v29 = vmul.f32 %v126_v26, %v48_v27  ;;  %v46_v31 = vsel %vm45_vm4, %v124_v20, %v42_v28 }
  0x8f   :  { %v57_v34 = vmul.f32 %v46_v31, %v15_v0 }
  0x90   :  { %v50_v30 = vmul.f32 0.5, %v49_v29 }
  0x91   :  { %v63_v38 = vmul.f32 %v120_v35, %v57_v34 }
  0x92   :  { %v51_v32 = vsub.f32 1.5, %v50_v30 }
  0x94   :  { %v52_v33 = vmul.f32 %v126_v26, %v51_v32 }
  0x96   :  { %v56_v36 = vsel %vm55_vm7, %v126_v26, %v52_v33 }
  0x97   :  { %v58_v37 = vmul.f32 %v56_v36, %v16_v2 }
  0x99   :  { %v64_v39 = vmul.f32 %v120_v35, %v58_v37 }
  0x9b   :  { %v65_v40 = vpack.c.bf16 %v64_v39, %v63_v38 }
  0x9d   :  { %116 = vmatmul.msk.bf16.vlgmr.msra.gmra.mxu0 %vm19_vm0, %v65_v40 }
 0x11a   :  { %v94_v41 = vpop.f32.mrf.mxu0 }
 0x11b   :  { %v99_v42 = vpack.c.bf16 %v94_v41, %v94_v41 }
 0x11d   :  { %102 = vst.msk [vmem:[%s175_s3] sm:$0xf] %vm101_vm8, %v99_v42 }
 0x122   :  { %v96_v43 = vpop.f32.mrf.mxu0 }
 0x123   :  { %v100_v44 = vpack.c.bf16 %v96_v43, %v96_v43 }
 0x125   :  { %103 = vst.msk [vmem:[%s175_s3 + $0x4] sm:$0xf] %vm101_vm8, %v100_v44 }

// kernel: fwd.9
= control target key start
LH: loop header
LB: loop body
LE: loop exit
PB: predicated region body
PF: predicated region fallthrough
CT: control target
= control target key end

     0   :  { %vm27_vm0 = vcmask 261120   ;;  %v300_v6 = vmov 32.0   ;;  %s377_s0 = inlined_call_operand.vmem [shape: f32[16,32], index: 0, kind: input, shape index: {}]   ;;  %s378_s1 = inlined_call_operand.vmem [shape: f32[1,32], index: 1, kind: input, shape index: {}]   ;;  %s379_s2 = inlined_call_operand.vmem [shape: bf16[32,48], index: 2, kind: input, shape index: {}]   ;;  %s380_s3 = inlined_call_operand.vmem [shape: bf16[32,48], index: 3, kind: input, shape index: {}]   ;;  %s381_s4 = inlined_call_operand.vmem [shape: bf16[48,32], index: 4, kind: input, shape index: {}]   ;;  %s382_s5 = inlined_call_operand.vmem [shape: f32[16,32], index: 5, kind: output, shape index: {}]  }
   0x1   :  { %v21_v0 = vld [vmem:[%s377_s0] sm:$0xff]  ;;  %v22_v2 = vld [vmem:[%s377_s0 + $0x8] sm:$0xff]  ;;  %286 = vrcp.f32 %v300_v6  ;;  %v283_v43 = vld [vmem:[%s381_s4 + $0x10] sm:$0xff] }
   0x2   :  { %v30_v1 = vmul.f32 %v21_v0, %v21_v0  ;;  %28 = vst.msk [vmem:[#allocation2] sm:$0xff] %vm27_vm0, %v21_v0  ;;  %v31_v4 = vmul.f32 %v22_v2, %v22_v2  ;;  %v278_v12 = vld [vmem:[%s379_s2 + $0x8] sm:$0xff]  ;;  %v277_v15 = vld [vmem:[%s379_s2] sm:$0xff]  ;;  %220 = vmatpush.bf16.msra.mxu2 %v283_v43 }
   0x3   :  { %29 = vst.msk [vmem:[#allocation2 + $0x8] sm:$0xff] %vm27_vm0, %v22_v2  ;;  %v280_v13 = vld [vmem:[%s380_s3 + $0x8] sm:$0xff]  ;;  %104 = vmatpush.bf16.msra.mxu0 %v278_v12  ;;  %v279_v16 = vld [vmem:[%s380_s3] sm:$0xff] }
   0x4   :  { %v33_v3 = vsel %vm27_vm0, %v30_v1, 0.0  ;;  %v36_v5 = vsel %vm27_vm0, %v31_v4, 0.0  ;;  %134 = vmatpush.bf16.msra.mxu1 %v280_v13  ;;  %v285_v37 = vld [vmem:[%s378_s1] ss:$0 sm:$0xff]  ;;  %v282_v46 = vld [vmem:[%s381_s4 + $0x8] sm:$0xff] }
   0x5   :  { %34 = vadd.xlane.f32.xlu0 %v33_v3  ;;  %v281_v47 = vld [vmem:[%s381_s4] sm:$0xff] }
   0x6   :  { %221 = vmatpush.bf16.msra.mxu2 %v282_v46 }
   0x7   :  { %v287_v7 = vpop.eup %286  ;;  %105 = vmatpush.bf16.msra.mxu0 %v277_v15 }
   0x8   :  { %v40_v8 = vmul.f32 32.0, %v287_v7  ;;  %vm44_vm1 = vweird.f32 %v287_v7  ;;  %135 = vmatpush.bf16.msra.mxu1 %v279_v16 }
   0xa   :  { %v41_v9 = vsub.f32 1.0, %v40_v8  ;;  %222 = vmatpush.bf16.msra.mxu2 %v281_v47 }
   0xc   :  { %v42_v10 = vmul.f32 %v287_v7, %v41_v9 }
   0xd   :  { %37 = vadd.xlane.f32.xlu0 %v36_v5 }
   0xe   :  { %v43_v11 = vadd.f32 %v287_v7, %v42_v10 }
  0x10   :  { %v45_v14 = vsel %vm44_vm1, %v287_v7, %v43_v11  ;;  %vm211_vm1 = vcmask 392192  }
  0x78   :  { %v35_v17 = vpop.xlane.xlu0 %34 }
  0x79   :  { %v46_v18 = vmul.f32 %v45_v14, %v35_v17  ;;  %v185_v17 = vld [vmem:[#allocation2] sm:$0xff] }
  0x7b   :  { %v48_v19 = vadd.f32 1e-06, %v46_v18 }
  0x7d   :  { %288 = vrsqrt.f32 %v48_v19  ;;  %vm56_vm3 = vweird.f32 %v48_v19 }
  0x80   :  { %v38_v20 = vpop.xlane.xlu0 %37 }
  0x81   :  { %v47_v21 = vmul.f32 %v45_v14, %v38_v20  ;;  %v186_v20 = vld [vmem:[#allocation2 + $0x8] sm:$0xff] }
  0x83   :  { %v289_v22 = vpop.eup %288  ;;  %v49_v23 = vadd.f32 1e-06, %v47_v21 }
  0x84   :  { %v51_v24 = vmul.f32 %v289_v22, %v48_v19  ;;  %vm57_vm2 = vweird.f32 %v289_v22 }
  0x85   :  { %290 = vrsqrt.f32 %v49_v23  ;;  %vm58_vm4 = vmor %vm56_vm3, %vm57_vm2  ;;  %vm66_vm6 = vweird.f32 %v49_v23 }
  0x86   :  { %v52_v25 = vmul.f32 %v289_v22, %v51_v24 }
  0x88   :  { %v53_v26 = vmul.f32 0.5, %v52_v25 }
  0x8a   :  { %v54_v27 = vsub.f32 1.5, %v53_v26 }
  0x8b   :  { %v291_v28 = vpop.eup %290 }
  0x8c   :  { %v61_v29 = vmul.f32 %v291_v28, %v49_v23  ;;  %v55_v30 = vmul.f32 %v289_v22, %v54_v27  ;;  %vm67_vm5 = vweird.f32 %v291_v28 }
  0x8d   :  { %vm68_vm7 = vmor %vm66_vm6, %vm67_vm5 }
  0x8e   :  { %v62_v31 = vmul.f32 %v291_v28, %v61_v29  ;;  %v59_v33 = vsel %vm58_vm4, %v289_v22, %v55_v30 }
  0x8f   :  { %v70_v36 = vmul.f32 %v59_v33, %v21_v0 }
  0x90   :  { %v63_v32 = vmul.f32 0.5, %v62_v31 }
  0x91   :  { %v76_v40 = vmul.f32 %v285_v37, %v70_v36 }
  0x92   :  { %v64_v34 = vsub.f32 1.5, %v63_v32 }
  0x94   :  { %v65_v35 = vmul.f32 %v291_v28, %v64_v34 }
  0x96   :  { %v69_v38 = vsel %vm68_vm7, %v291_v28, %v65_v35 }
  0x97   :  { %v71_v39 = vmul.f32 %v69_v38, %v22_v2 }
  0x99   :  { %v77_v41 = vmul.f32 %v285_v37, %v71_v39 }
  0x9b   :  { %v78_v42 = vpack.c.bf16 %v77_v41, %v76_v40 }
  0x9d   :  { %252 = vmatmul.msk.bf16.vlgmr.msra.gmra.mxu0 %vm27_vm0, %v78_v42  ;;  %261 = vmatmul.msk.bf16.vlgmr.msra.gmra.mxu1 %vm27_vm0, %v78_v42 }
 0x11a   :  { %v107_v44 = vpop.f32.mrf.mxu0  ;;  %v137_v63 = vpop.f32.mrf.mxu1 }
 0x11b   :  { %v262_v45 = vmul.f32 -1.442695, %v107_v44 }
 0x11d   :  { %292 = vpow2.f32 %v262_v45 }
 0x122   :  { %v109_v48 = vpop.f32.mrf.mxu0  ;;  %v139_v13 = vpop.f32.mrf.mxu1 }
 0x123   :  { %v293_v49 = vpop.eup %292  ;;  %v263_v50 = vmul.f32 -1.442695, %v109_v48 }
 0x124   :  { %v148_v51 = vadd.f32 1.0, %v293_v49 }
 0x125   :  { %294 = vpow2.f32 %v263_v50 }
 0x126   :  { %296 = vrcp.f32 %v148_v51  ;;  %v161_v60 = vand.u32 2147483648, %v148_v51  ;;  %vm155_vm9 = vweird.f32 %v148_v51  ;;  %v159_v61 = vand.u32 2147483647, %v148_v51 }
 0x128   :  { %v162_v2 = vor.u32 1.1754944e-38, %v161_v60  ;;  %vm160_vm11 = vcmp.eq.f32.partialorder %v159_v61, 8.507059e+37 }
 0x12b   :  { %v295_v52 = vpop.eup %294 }
 0x12c   :  { %v297_v53 = vpop.eup %296  ;;  %v149_v54 = vadd.f32 1.0, %v295_v52 }
 0x12d   :  { %v151_v55 = vmul.f32 %v297_v53, %v148_v51  ;;  %vm156_vm8 = vweird.f32 %v297_v53 }
 0x12e   :  { %298 = vrcp.f32 %v149_v54  ;;  %vm157_vm10 = vmor %vm155_vm9, %vm156_vm8  ;;  %v176_v3 = vand.u32 2147483648, %v149_v54  ;;  %v174_v5 = vand.u32 2147483647, %v149_v54  ;;  %vm170_vm13 = vweird.f32 %v149_v54 }
 0x12f   :  { %v152_v56 = vsub.f32 1.0, %v151_v55 }
 0x130   :  { %v177_v8 = vor.u32 1.1754944e-38, %v176_v3  ;;  %vm175_vm15 = vcmp.eq.f32.partialorder %v174_v5, 8.507059e+37 }
 0x131   :  { %v153_v57 = vmul.f32 %v297_v53, %v152_v56 }
 0x133   :  { %v154_v58 = vadd.f32 %v297_v53, %v153_v57 }
 0x134   :  { %v299_v59 = vpop.eup %298 }
 0x135   :  { %v166_v62 = vmul.f32 %v299_v59, %v149_v54  ;;  %v158_v0 = vsel %vm157_vm10, %v297_v53, %v154_v58  ;;  %vm171_vm12 = vweird.f32 %v299_v59 }
 0x136   :  { %v163_v6 = vsel %vm160_vm11, %v162_v2, %v158_v0  ;;  %vm172_vm14 = vmor %vm170_vm13, %vm171_vm12 }
 0x137   :  { %v167_v1 = vsub.f32 1.0, %v166_v62  ;;  %v180_v9 = vmul.f32 %v163_v6, %v107_v44 }
 0x139   :  { %v168_v4 = vmul.f32 %v299_v59, %v167_v1  ;;  %v182_v14 = vmul.f32 %v180_v9, %v137_v63 }
 0x13b   :  { %v169_v7 = vadd.f32 %v299_v59, %v168_v4 }
 0x13d   :  { %v173_v10 = vsel %vm172_vm14, %v299_v59, %v169_v7 }
 0x13e   :  { %v178_v11 = vsel %vm175_vm15, %v177_v8, %v173_v10 }
 0x13f   :  { %v181_v12 = vmul.f32 %v178_v11, %v109_v48 }
 0x141   :  { %v183_v15 = vmul.f32 %v181_v12, %v139_v13 }
 0x143   :  { %v184_v16 = vpack.c.bf16 %v183_v15, %v182_v14 }
 0x145   :  { %276 = vmatmul.msk.bf16.vlgmr.msra.gmra.mxu2 %vm211_vm1, %v184_v16 }
 0x1c8   :  { %v224_v18 = vpop.f32.mrf.mxu2 }
 0x1c9   :  { %v229_v19 = vadd.f32 %v224_v18, %v185_v17 }
 0x1cb   :  { %231 = vst.msk [vmem:[#allocation2] sm:$0xff] %vm27_vm0, %v229_v19 }
 0x1d0   :  { %v226_v21 = vpop.f32.mrf.mxu2 }
 0x1d1   :  { %v230_v22 = vadd.f32 %v226_v21, %v186_v20 }
 0x1d2   :  { %v236_v23 = vld [vmem:[#allocation2] sm:$0xff] }
 0x1d3   :  { %238 = vst.msk [vmem:[%s382_s5] sm:$0xff] %vm27_vm0, %v236_v23 }
 0x1d4   :  { %232 = vst.msk [vmem:[#allocation2 + $0x8] sm:$0xff] %vm27_vm0, %v230_v22 }
 0x1db   :  { %v237_v24 = vld [vmem:[#allocation2 + $0x8] sm:$0xff] }
 0x1dc   :  { %239 = vst.msk [vmem:[%s382_s5 + $0x8] sm:$0xff] %vm27_vm0, %v237_v24 }

</bundles_post_ra>
